<compile_context>
chip_gen: v7x
topology: tpu7x:2x2x1
jax: 0.10.0
libtpu: 0.0.40
codegen_flags: <defaults>
</compile_context>

<pallas_src>
import jax
import jax.numpy as jnp
from jax import lax
from jax.experimental import pallas as pl
from jax.experimental.pallas import tpu as pltpu


def _round_up(n, m):
    return (n + m - 1) // m * m


def _tile_budget(compute_dtype):
    """Per-generation (tb_cap, vmem_limit_bytes), sized on the lane-padded footprint."""
    itemsize = jnp.dtype(compute_dtype).itemsize
    try:
        kind = jax.devices()[0].device_kind.lower()
    except Exception:  # pragma: no cover - defensive
        kind = ""
    if ("v5" in kind) or ("v6" in kind):
        # v5e / v6e: 128 MiB physical VMEM -> raise scoped limit, allow 16 MiB x-buffers.
        vmem_limit = 96 * 1024 * 1024
        x_buf_bytes = 16 * 1024 * 1024
    else:
        # v7x (64 MiB per TC) or unknown: stay conservative.
        vmem_limit = 32 * 1024 * 1024
        x_buf_bytes = 8 * 1024 * 1024
    # x block is (tb, D) but occupies tb * 128 lanes in VMEM (D=32 pads to 128).
    tb_cap = x_buf_bytes // (128 * itemsize)
    return tb_cap, vmem_limit


def mlp_kernel(x_ref, w1_ref, b1_ref, w2_ref, b2_ref, w3t_ref, b3_ref, o_ref):
    x = x_ref[...]                                    # (tb, D), compute dtype

    # body: Linear(D, 32) + ReLU   (MXU accumulates in f32, bias/ReLU in f32)
    h1 = jnp.dot(x, w1_ref[...], preferred_element_type=jnp.float32) + b1_ref[...]
    h1 = jnp.maximum(h1, 0.0)

    # body: Linear(32, 16) + ReLU
    h2 = jnp.dot(h1.astype(w2_ref.dtype), w2_ref[...],
                 preferred_element_type=jnp.float32) + b2_ref[...]
    h2 = jnp.maximum(h2, 0.0)

    # head: Linear(16, 1), computed transposed:  (1,16) . (tb,16)^T -> (1, tb)
    # keeps the output store lane-dense instead of a (tb, 1) masked column.
    logits = lax.dot_general(
        w3t_ref[...], h2.astype(w3t_ref.dtype),
        dimension_numbers=(((1,), (1,)), ((), ())),
        preferred_element_type=jnp.float32,
    ) + b3_ref[...]                                   # (1, tb)

    # sigmoid = 1 / (1 + exp(-x)); exp on EUP, exact reciprocal (keeps 1e-5 tolerance).
    o_ref[0] = pl.reciprocal(1.0 + jnp.exp(-logits), approx=False)


def mlp_forward(x, params, *, block_b=32768, compute_dtype=jnp.bfloat16):
    """Forward pass of the MLP. x: (B, D) float32. Returns (B, 1) float32."""
    w1, b1, w2, b2, w3t, b3 = params
    B, D = x.shape

    tb_cap, vmem_limit = _tile_budget(compute_dtype)
    # dtype-aware sublane multiple: 8 for f32, 16 for bf16 (packed sublanes).
    sub = 16 if jnp.dtype(compute_dtype).itemsize == 2 else 8

    B_sub = _round_up(B, sub)
    tb = min(_round_up(block_b, sub), _round_up(tb_cap, sub), B_sub)
    # Guarantee >=2 grid blocks for large-enough batches so the "parallel" batch
    # axis can shard across v7x's two TensorCores (neutral on v5e/v6e).
    if B_sub >= 2 * sub and tb >= B_sub:
        tb = _round_up((B_sub + 1) // 2, sub)
    tb = max(tb, sub)

    Bp = _round_up(B, tb)
    if Bp != B:
        x = jnp.pad(x, ((0, Bp - B), (0, 0)))         # pad ragged tail; sliced off below
    num_blocks = Bp // tb

    # bf16 (default) on the HBM-heavy operands (x, weights); biases stay f32 since
    # they are added after f32 MXU accumulation.
    x = x.astype(compute_dtype)
    w1 = w1.astype(compute_dtype)
    w2 = w2.astype(compute_dtype)
    w3t = w3t.astype(compute_dtype)

    def resident(arr):
        # Constant index_map -> fetched once, VMEM-resident; single buffer suffices.
        return pl.BlockSpec(arr.shape, lambda i: (0, 0), pipeline_mode=pl.Buffered(1))

    itemsize = jnp.dtype(compute_dtype).itemsize
    cost = pl.CostEstimate(
        flops=2 * Bp * (D * 32 + 32 * 16 + 16 * 1),
        transcendentals=Bp,                                  # one exp per row (sigmoid)
        bytes_accessed=(Bp * max(D, 128) * itemsize          # lane-padded x stream
                        + num_blocks * 8 * tb * 4            # sublane-padded writeback
                        + sum(int(a.size) * a.dtype.itemsize
                              for a in (w1, b1, w2, b2, w3t, b3))),
    )

    out = pl.pallas_call(
        mlp_kernel,
        out_shape=jax.ShapeDtypeStruct((num_blocks, 1, tb), jnp.float32),
        grid=(num_blocks,),
        in_specs=[
            pl.BlockSpec((tb, D), lambda i: (i, 0)),  # x: streamed, double-buffered
            resident(w1), resident(b1),
            resident(w2), resident(b2),
            resident(w3t), resident(b3),
        ],
        out_specs=pl.BlockSpec((1, 1, tb), lambda i: (i, 0, 0)),  # lane-dense rows
        compiler_params=pltpu.CompilerParams(
            dimension_semantics=("parallel",),        # shard batch over TCs (v7x)
            vmem_limit_bytes=vmem_limit,              # per-generation budget
        ),
        cost_estimate=cost,
    )(x, w1, b1, w2, b2, w3t, b3)

    return out.reshape(Bp, 1)[:B]


def init_params(key, input_dim):
    # Deterministic synthetic init (uniform, roughly matching nn.Linear's scale).
    ks = jax.random.split(key, 6)

    def lin(kw, kb, fan_in, fan_out, transpose=False):
        bound = 1.0 / jnp.sqrt(fan_in)
        shape = (fan_out, fan_in) if transpose else (fan_in, fan_out)
        w = jax.random.uniform(kw, shape, jnp.float32, -bound, bound)
        b = jax.random.uniform(kb, (1, fan_out), jnp.float32, -bound, bound)
        return w, b

    w1, b1 = lin(ks[0], ks[1], input_dim, 32)            # (D, 32)  [in, out]
    w2, b2 = lin(ks[2], ks[3], 32, 16)                   # (32, 16) [in, out]
    w3t, b3 = lin(ks[4], ks[5], 16, 1, transpose=True)   # (1, 16)  [out, in]
    return (w1, b1, w2, b2, w3t, b3)


def reference(x, params):
    w1, b1, w2, b2, w3t, b3 = params
    h = jnp.maximum(x @ w1 + b1, 0.0)
    h = jnp.maximum(h @ w2 + b2, 0.0)
    return 1.0 / (1.0 + jnp.exp(-(h @ w3t.T + b3)))


if __name__ == "__main__":
    key = jax.random.PRNGKey(0)
    k_x, k_x2, k_p = jax.random.split(key, 3)

    input_dim = 32
    params = init_params(k_p, input_dim)

    # Small demo shape, strict f32 check (single grid step).
    batch = 8
    x = jax.random.normal(k_x, (batch, input_dim), jnp.float32)
    out = mlp_forward(x, params, compute_dtype=jnp.float32)
    jax.block_until_ready(out)
    assert out.shape == (batch, 1)
    assert jnp.allclose(out, reference(x, params), atol=1e-5, rtol=1e-5)

    # Ragged batch: exercises padding, multi-block grid and the >=2-block split, f32.
    x2 = jax.random.normal(k_x2, (300, input_dim), jnp.float32)
    out2 = mlp_forward(x2, params, block_b=128, compute_dtype=jnp.float32)
    jax.block_until_ready(out2)
    assert out2.shape == (300, 1)
    assert jnp.allclose(out2, reference(x2, params), atol=1e-5, rtol=1e-5)

    # Default path (bf16 x/weights, large tile): halves the dominant HBM stream;
    # MXU still accumulates in f32, so accuracy loss is bounded.
    out3 = mlp_forward(x2, params)
    jax.block_until_ready(out3)
    assert out3.shape == (300, 1)
    assert jnp.allclose(out3, reference(x2, params), atol=5e-2)

    print("KERNEL_OK")
</pallas_src>

<mosaic_0001>
module attributes {stable_mosaic.version = 11 : i64} {
  func.func @mlp_kernel(%arg0: i32, %arg1: memref<8x32xf32, #tpu.memory_space<vmem>>, %arg2: memref<32x32xf32, #tpu.memory_space<vmem>>, %arg3: memref<1x32xf32, #tpu.memory_space<vmem>>, %arg4: memref<32x16xf32, #tpu.memory_space<vmem>>, %arg5: memref<1x16xf32, #tpu.memory_space<vmem>>, %arg6: memref<1x16xf32, #tpu.memory_space<vmem>>, %arg7: memref<1x1xf32, #tpu.memory_space<vmem>>, %arg8: memref<1x1x8xf32, #tpu.memory_space<vmem>>) attributes {dimension_semantics = [#tpu.dimension_semantics<parallel>], iteration_bounds = array<i64: 1>, scalar_prefetch = 0 : i64, scratch_operands = 0 : i64, tpu.core_type = #tpu.core_type<tc>, window_params = [{transform_indices = @transform_0, window_bounds = array<i64: 8, 32>}, {pipeline_mode = #tpu.pipeline_mode<synchronous>, transform_indices = @transform_1, window_bounds = array<i64: 32, 32>}, {pipeline_mode = #tpu.pipeline_mode<synchronous>, transform_indices = @transform_2, window_bounds = array<i64: 1, 32>}, {pipeline_mode = #tpu.pipeline_mode<synchronous>, transform_indices = @transform_3, window_bounds = array<i64: 32, 16>}, {pipeline_mode = #tpu.pipeline_mode<synchronous>, transform_indices = @transform_4, window_bounds = array<i64: 1, 16>}, {pipeline_mode = #tpu.pipeline_mode<synchronous>, transform_indices = @transform_5, window_bounds = array<i64: 1, 16>}, {pipeline_mode = #tpu.pipeline_mode<synchronous>, transform_indices = @transform_6, window_bounds = array<i64: 1, 1>}, {transform_indices = @transform_7, window_bounds = array<i64: 1, 1, 8>}]} {
    %c0 = arith.constant 0 : index
    %c0_0 = arith.constant 0 : index
    %0 = vector.load %arg1[%c0, %c0_0] : memref<8x32xf32, #tpu.memory_space<vmem>>, vector<8x32xf32>
    %c0_1 = arith.constant 0 : index
    %c0_2 = arith.constant 0 : index
    %1 = vector.load %arg2[%c0_1, %c0_2] : memref<32x32xf32, #tpu.memory_space<vmem>>, vector<32x32xf32>
    %cst = arith.constant dense<0.000000e+00> : vector<8x32xf32>
    %2 = tpu.matmul %0, %1, %cst {dimension_numbers = #tpu.dot_dimension_numbers<[1], [0], [0], [1], [0, 0, 1, 1], [], []>} : vector<8x32xf32>, vector<32x32xf32>, vector<8x32xf32> -> vector<8x32xf32>
    %c0_3 = arith.constant 0 : index
    %c0_4 = arith.constant 0 : index
    %3 = vector.load %arg3[%c0_3, %c0_4] : memref<1x32xf32, #tpu.memory_space<vmem>>, vector<1x32xf32>
    %4 = vector.broadcast %3 : vector<1x32xf32> to vector<8x32xf32>
    %5 = arith.addf %2, %4 : vector<8x32xf32>
    %cst_5 = arith.constant 0.000000e+00 : f32
    %6 = vector.broadcast %cst_5 : f32 to vector<8x32xf32>
    %7 = arith.maximumf %5, %6 : vector<8x32xf32>
    %c0_6 = arith.constant 0 : index
    %c0_7 = arith.constant 0 : index
    %8 = vector.load %arg4[%c0_6, %c0_7] : memref<32x16xf32, #tpu.memory_space<vmem>>, vector<32x16xf32>
    %cst_8 = arith.constant dense<0.000000e+00> : vector<8x16xf32>
    %9 = tpu.matmul %7, %8, %cst_8 {dimension_numbers = #tpu.dot_dimension_numbers<[1], [0], [0], [1], [0, 0, 1, 1], [], []>} : vector<8x32xf32>, vector<32x16xf32>, vector<8x16xf32> -> vector<8x16xf32>
    %c0_9 = arith.constant 0 : index
    %c0_10 = arith.constant 0 : index
    %10 = vector.load %arg5[%c0_9, %c0_10] : memref<1x16xf32, #tpu.memory_space<vmem>>, vector<1x16xf32>
    %11 = vector.broadcast %10 : vector<1x16xf32> to vector<8x16xf32>
    %12 = arith.addf %9, %11 : vector<8x16xf32>
    %cst_11 = arith.constant 0.000000e+00 : f32
    %13 = vector.broadcast %cst_11 : f32 to vector<8x16xf32>
    %14 = arith.maximumf %12, %13 : vector<8x16xf32>
    %c0_12 = arith.constant 0 : index
    %c0_13 = arith.constant 0 : index
    %15 = vector.load %arg6[%c0_12, %c0_13] : memref<1x16xf32, #tpu.memory_space<vmem>>, vector<1x16xf32>
    %cst_14 = arith.constant dense<0.000000e+00> : vector<1x8xf32>
    %16 = tpu.matmul %15, %14, %cst_14 {dimension_numbers = #tpu.dot_dimension_numbers<[1], [1], [0], [0], [0, 0, 1, 0], [], []>} : vector<1x16xf32>, vector<8x16xf32>, vector<1x8xf32> -> vector<1x8xf32>
    %c0_15 = arith.constant 0 : index
    %c0_16 = arith.constant 0 : index
    %17 = vector.load %arg7[%c0_15, %c0_16] : memref<1x1xf32, #tpu.memory_space<vmem>>, vector<1x1xf32>
    %18 = vector.broadcast %17 : vector<1x1xf32> to vector<1x8xf32>
    %19 = arith.addf %16, %18 : vector<1x8xf32>
    %cst_17 = arith.constant 0.000000e+00 : f32
    %20 = vector.broadcast %cst_17 : f32 to vector<1x8xf32>
    %21 = arith.subf %20, %19 : vector<1x8xf32>
    %22 = math.exp %21 : vector<1x8xf32>
    %cst_18 = arith.constant 1.000000e+00 : f32
    %23 = vector.broadcast %cst_18 : f32 to vector<1x8xf32>
    %24 = arith.addf %23, %22 : vector<1x8xf32>
    %25 = tpu.reciprocal %24 : vector<1x8xf32> -> vector<1x8xf32>
    %c0_19 = arith.constant 0 : index
    %c0_20 = arith.constant 0 : index
    %c0_21 = arith.constant 0 : index
    %26 = vector.load %arg8[%c0_19, %c0_20, %c0_21] : memref<1x1x8xf32, #tpu.memory_space<vmem>>, vector<1x1x8xf32>
    %27 = vector.shape_cast %26 : vector<1x1x8xf32> to vector<1x8xf32>
    %28 = vector.shape_cast %25 : vector<1x8xf32> to vector<1x1x8xf32>
    tpu.vector_store %arg8[%c0_19, %c0_20, %c0_21], %28 {strides = array<i32>} : memref<1x1x8xf32, #tpu.memory_space<vmem>>, vector<1x1x8xf32>,
    return
  }
  func.func @transform_0(%arg0: i32) -> (i32, i32) {
    %c0_i32 = arith.constant 0 : i32
    %c0_i32_0 = arith.constant 0 : i32
    return %arg0, %c0_i32 : i32, i32
  }
  func.func @transform_1(%arg0: i32) -> (i32, i32) {
    %c0_i32 = arith.constant 0 : i32
    %c0_i32_0 = arith.constant 0 : i32
    %c0_i32_1 = arith.constant 0 : i32
    return %c0_i32, %c0_i32_0 : i32, i32
  }
  func.func @transform_2(%arg0: i32) -> (i32, i32) {
    %c0_i32 = arith.constant 0 : i32
    %c0_i32_0 = arith.constant 0 : i32
    %c0_i32_1 = arith.constant 0 : i32
    return %c0_i32, %c0_i32_0 : i32, i32
  }
  func.func @transform_3(%arg0: i32) -> (i32, i32) {
    %c0_i32 = arith.constant 0 : i32
    %c0_i32_0 = arith.constant 0 : i32
    %c0_i32_1 = arith.constant 0 : i32
    return %c0_i32, %c0_i32_0 : i32, i32
  }
  func.func @transform_4(%arg0: i32) -> (i32, i32) {
    %c0_i32 = arith.constant 0 : i32
    %c0_i32_0 = arith.constant 0 : i32
    %c0_i32_1 = arith.constant 0 : i32
    return %c0_i32, %c0_i32_0 : i32, i32
  }
  func.func @transform_5(%arg0: i32) -> (i32, i32) {
    %c0_i32 = arith.constant 0 : i32
    %c0_i32_0 = arith.constant 0 : i32
    %c0_i32_1 = arith.constant 0 : i32
    return %c0_i32, %c0_i32_0 : i32, i32
  }
  func.func @transform_6(%arg0: i32) -> (i32, i32) {
    %c0_i32 = arith.constant 0 : i32
    %c0_i32_0 = arith.constant 0 : i32
    %c0_i32_1 = arith.constant 0 : i32
    return %c0_i32, %c0_i32_0 : i32, i32
  }
  func.func @transform_7(%arg0: i32) -> (i32, i32, i32) {
    %c0_i32 = arith.constant 0 : i32
    %c0_i32_0 = arith.constant 0 : i32
    %c0_i32_1 = arith.constant 0 : i32
    return %arg0, %c0_i32, %c0_i32_0 : i32, i32, i32
  }
}

</mosaic_0001>

<bundles_post_ra>
// kernel: tpu_custom_call.1
= control target key start
LH: loop header
LB: loop body
LE: loop exit
PB: predicated region body
PF: predicated region fallthrough
CT: control target
= control target key end

     0   :  { %s500_s0 = inlined_call_operand.vmem [shape: f32[8,32], index: 0, kind: input, shape index: {}]   ;;  %s501_s1 = inlined_call_operand.vmem [shape: f32[32,32], index: 1, kind: input, shape index: {}]   ;;  %s502_s2 = inlined_call_operand.vmem [shape: f32[1,32], index: 2, kind: input, shape index: {}]   ;;  %s503_s3 = inlined_call_operand.vmem [shape: f32[32,16], index: 3, kind: input, shape index: {}]   ;;  %s504_s4 = inlined_call_operand.vmem [shape: f32[1,16], index: 4, kind: input, shape index: {}]   ;;  %s505_s5 = inlined_call_operand.vmem [shape: f32[1,16], index: 5, kind: input, shape index: {}]   ;;  %s506_s6 = inlined_call_operand.<no memory space> [shape: f32[1,1], index: 6, kind: input, shape index: {}]   ;;  %s507_s7 = inlined_call_operand.hbm [shape: f32[1,1,8], index: 7, kind: output, shape index: {}]  }
   0x1   :  { %v12_v0 = vstv %s506_s6 }
   0x2   :  { %13 = vst [vmem:[#allocation2] sm:$0x1] %v12_v0 }
   0x3   :  { %v30_v1 = vld [vmem:[%s501_s1] sm:$0xff]  ;;  %v31_v2 = vld [vmem:[%s501_s1 + $0x8] sm:$0xff]  ;;  %v32_v3 = vld [vmem:[%s501_s1 + $0x10] sm:$0xff]  ;;  %v401_v4 = vmov 0.0|0.0   ;;  %vm402_vm0 = vmmov 0   ;;  %v403_v7 = vmov 0.0  }
   0x4   :  { %355 = vmatprep.subr.bf16.mxu0 %v401_v4  ;;  %v356_v5 = vpack.c.bf16 %v31_v2, %v30_v1  ;;  %v33_v6 = vld [vmem:[%s501_s1 + $0x18] sm:$0xff]  ;;  %336 = vmatprep.mubr.msk.f32.mxu0 %vm402_vm0, %v403_v7  ;;  %v116_v8 = vld [vmem:[%s503_s3] sm:$0xff]  ;;  %v117_v9 = vld [vmem:[%s503_s3 + $0x8] sm:$0xff] }
   0x5   :  { %361 = vmatprep.subr.bf16.mxu1 %v401_v4  ;;  %347 = vmatprep.mubr.msk.f32.mxu1 %vm402_vm0, %v403_v7 }
   0x6   :  { %14 = vsyncpa [#allocation4], 0  ;;  %357 = vmatpush3.bf16.msra.mxu0 %v356_v5  ;;  %v359_v10 = vpack.c.bf16 %v33_v6, %v32_v3  ;;  %v362_v11 = vpack.c.bf16 %v117_v9, %v116_v8  ;;  %v29_v12 = vld [vmem:[%s500_s0] sm:$0xff]  ;;  %vm41_vm1 = vcmask 261120   ;;  %v118_v13 = vld [vmem:[%s503_s3 + $0x10] sm:$0xff]  ;;  %v404_v22 = vmov 0  }
   0x7   :  { %358 = vmatprep.subr.bf16.mxu0 %v401_v4  ;;  %v119_v14 = vld [vmem:[%s503_s3 + $0x18] sm:$0xff]  ;;  %v310_v16 = vld [vmem:[%s502_s2] ss:$0 sm:$0xff]  ;;  %372 = vset.pattern.permute.xlu0 %v404_v22  ;;  %vm212_vm2 = vcmask 130048   ;;  %v208_v29 = vlaneseq  ;;  %vm294_vm3 = vcmask 57344  }
   0x8   :  { %363 = vmatpush3.bf16.msra.mxu1 %v362_v11  ;;  %v365_v15 = vpack.c.bf16 %v119_v14, %v118_v13  ;;  %v312_v23 = vld [vmem:[%s504_s4] ss:$0 sm:$0xff]  ;;  %s405_s4 = smov [#allocation3]  }
   0x9   :  { %364 = vmatprep.subr.bf16.mxu1 %v401_v4  ;;  %v202_v21 = vld [vmem:[#allocation2] sm:$0x1]  ;;  %v209_v30 = vshrl.u32 %v208_v29, 7  ;;  %s302_s22 = sshll.u32 %s405_s4, 4  ;;  %s303_s22 = int_to_ptr.vmem [resolvable:$true] %s302_s22 }
   0xa   :  { %360 = vmatpush3.bf16.msra.mxu0 %v359_v10  ;;  %205 = vperm.xlu0 %372, %v202_v21   ;;  %v201_v28 = vld [vmem:[%s505_s5] sm:$0x1]  ;;  %s377_s5 = scalar_lea.vmem %s303_s22, 16  ;;  %s381_s23 = scalar_lea.vmem %s303_s22, 32 }
   0xb   :  { %350 = vmatprep.subr.mxu0 %v403_v7  ;;  %v210_v31 = vsub.s32 0, %v209_v30  ;;  %p378_p0 = scmp.ne.s32.totalorder %s303_s22, %s377_s5  ;;  %p382_p1 = scmp.lt.s32.totalorder %s303_s22, %s303_s22 }
   0xc   :  { %366 = vmatpush3.bf16.msra.mxu1 %v365_v15  ;;  %p383_p2 = scmp.lt.s32.totalorder %s381_s23, %s377_s5 }
   0xd   :  { %337 = vmatmul.mubr.msk.f32.vlgmr.msra.gmra.mrb[0].mxu0 %vm41_vm1, %v29_v12 }
   0xe   :  { %352 = vmatprep.mubr.msk.f32.mxu0 %vm402_vm0, %v403_v7  ;;  %p384_p3 = por %p383_p2, %p382_p1 }
  0x10   :  { %p385_p4 = pnand %p384_p3, %p378_p0 }
  0x89   :  { %v206_v32 = vpop.permute.xlu0 %205 }
  0x8a   :  { %v211_v33 = vrot.slane %v206_v32, %v210_v31 }
  0xe0   :  { %v111_v17 = vpop.f32.mrb[0].mxu0 }
  0xe1   :  { %v112_v18 = vadd.f32 %v310_v16, %v111_v17  ;;  %v338_v19 = vpop.f32.mrb[1].mxu0 }
  0xe3   :  { %v115_v20 = vmax.f32 %v112_v18, 0.0 }
  0xe5   :  { %348 = vmatmul.mubr.msk.f32.vlgmr.msra.gmra.mrb[0].mxu1 %vm41_vm1, %v115_v20 }
 0x1b8   :  { %v196_v24 = vpop.f32.mrb[0].mxu1 }
 0x1b9   :  { %v197_v25 = vadd.f32 %v312_v23, %v196_v24  ;;  %v349_v26 = vpop.f32.mrb[1].mxu1 }
 0x1bb   :  { %v200_v27 = vmax.f32 %v197_v25, 0.0 }
 0x1bd   :  { %351 = vmatpush3.xpose.msk.msra.mxu0 %vm212_vm2, %v200_v27 }
 0x1c0   :  { %353 = vmatmul.mubr.msk.f32.vlgmr.msra.gmra.mrb[2].mxu0 %vm212_vm2, %v201_v28 }
 0x293   :  { %v285_v34 = vpop.f32.mrb[2].mxu0 }
 0x294   :  { %v286_v35 = vadd.f32 %v285_v34, %v211_v33  ;;  %v354_v36 = vpop.f32.mrb[3].mxu0 }
 0x296   :  { %v289_v37 = vsub.f32 0.0, %v286_v35 }
 0x298   :  { %v290_v38 = vmul.f32 1.442695, %v289_v37 }
 0x29a   :  { %373 = vpow2.f32 %v290_v38 }
 0x2a4   :  { %v374_v39 = vpop.eup %373 }
 0x2a5   :  { %v292_v40 = vadd.f32 1.0, %v374_v39 }
 0x2a7   :  { %375 = vrcp.f32 %v292_v40 }
 0x2b1   :  { %v376_v41 = vpop.eup %375 }
 0x2b2   :  { %295 = vst.msk [vmem:[#allocation3] sm:$0x1] %vm294_vm3, %v376_v41 }
 0x2b3   :  { %388 = shalt.err (!%p385_p4)
}
 0x2b4   :  { %s389_s26 = scalar_lea.hbm %s507_s7, 16 }
 0x2b5   :  { %p390_p5 = scmp.ne.s32.totalorder %s507_s7, %s389_s26  ;;  %p393_p6 = scmp.lt.u32.totalorder %s389_s26, %s507_s7 }
 0x2b7   :  { %p395_p7 = pnand %p393_p6, %p390_p5 }
 0x2b9   :  { %398 = shalt.err (!%p395_p7)
}
 0x2ba   :  { %305 = dma.vmem_to_hbm [thread:$0]  %s303_s22, 16, %s507_s7, [#allocation4]  }
 0x2bb   :  { %399 = dma.done.wait [#allocation4], 16  }
 0x2bc   :  { %400 = vsyncadd [#allocation4], 4294967280 }
 0x2bd   :  { %309 = vsyncpa [#allocation4], 1 }

</bundles_post_ra>
